<compile_context>
chip_gen: v7x
topology: tpu7x:2x2x1
jax: 0.10.0
libtpu: 0.0.40
codegen_flags: <defaults>
</compile_context>

<pallas_src>
import functools

import jax
import jax.numpy as jnp
from jax.experimental import pallas as pl
from jax.experimental.pallas import tpu as pltpu

_LANES = 128


def _round_up(x, m):
    return (x + m - 1) // m * m


def _semidual_min_kernel(xs_ref, yt_ref, b_ref, o_ref):
    """One (i, j) grid step.

    xs_ref : (tm, D)   resident tile of (-2 * x)  (same block across j)
    yt_ref : (D, tn)   streamed tile of y^T
    b_ref  : (1, tn)   f32 tile of (||y||^2 - psi); +inf on padded columns
    o_ref  : (tm, 128) lane-wide running-min slab (f32), output accumulator
    """
    j = pl.program_id(1)

    @pl.when(j == 0)
    def _():
        o_ref[...] = jnp.full_like(o_ref, jnp.inf)

    dot = jnp.dot(xs_ref[...], yt_ref[...],
                  preferred_element_type=jnp.float32)            # (tm, tn) MXU
    c = dot + b_ref[...]                                         # (tm, tn) VPU
    # ||x||^2 is j-invariant and is added in f32 in the wrapper glue.

    # Pairwise tree-fold of the tn/128 lane chunks (pure VPU mins), then one
    # read-modify-write against the resident output slab.  The cross-lane
    # (XLU) reduce happens once per row in XLA, outside the kernel.
    chunks = [c[:, k * _LANES:(k + 1) * _LANES]
              for k in range(c.shape[1] // _LANES)]
    while len(chunks) > 1:
        nxt = [jnp.minimum(chunks[k], chunks[k + 1])
               for k in range(0, len(chunks) - 1, 2)]
        if len(chunks) % 2:
            nxt.append(chunks[-1])
        chunks = nxt
    o_ref[...] = jnp.minimum(o_ref[...], chunks[0])


def _hw_params():
    """Generation-aware tuning: (num_tensorcores, vmem_budget, vmem_limit, tm_target)."""
    try:
        kind = jax.devices()[0].device_kind.lower()
    except Exception:
        kind = ""
    if "v7" in kind:
        gen = 7
    elif "v6" in kind:
        gen = 6
    elif "v5" in kind:
        gen = 5
    else:
        gen = 6  # unknown: assume v6e-like

    num_tc = 2 if gen >= 7 else 1
    try:
        vmem_cap = int(pltpu.get_tpu_info().vmem_capacity_bytes)
    except Exception:
        vmem_cap = (64 if gen >= 7 else 128) * 1024 * 1024

    budget = int(vmem_cap * 0.65)                 # explicit working-set budget
    limit = min(int(vmem_cap * 0.90), budget + (16 << 20))

    if gen >= 7:
        tm_target = 512      # v7x MXU roofline needs only ~310 FLOP/byte
    elif gen == 6:
        tm_target = 1024     # v6e needs ~650+ rows of y^T reuse at bf16
    else:
        tm_target = 256      # v5e hits the HBM roofline by ~240 rows
    return num_tc, budget, limit, tm_target


def _choose_tiles(Nx, Ny, D, in_bytes, budget, tm_target, tn_target, num_tc):
    """Pick (tm, tn): prefer large tm (y^T reuse); tn multiple of 128; on
    multi-TC chips keep the i grid evenly divisible by the core count."""
    tm = min(_round_up(tm_target, 8), _round_up(Nx, 8))
    if num_tc >= 2:
        n_i = -(-Nx // tm)
        if n_i % num_tc:
            n_i2 = _round_up(n_i, num_tc)
            tm2 = _round_up(-(-Nx // n_i2), 8)
            if tm2 >= 256:          # never shrink MXU LHS height below 256
                tm = tm2

    def fits(tm_, tn_):
        # double-buffered resident x tile + double-buffered (tm,128) output slab
        fixed = 2 * tm_ * D * in_bytes + 2 * tm_ * _LANES * 4
        # per tn column: 2x streamed y^T + 2x streamed b + ~2x (tm,tn) f32
        # intermediates (MXU result + c) that Mosaic materializes in VMEM
        per_col = 2 * (D * in_bytes + 4) + 2 * tm_ * 4
        return fixed + per_col * tn_ <= budget

    tn = min(_round_up(tn_target, _LANES), _round_up(Ny, _LANES))
    tn = max(tn, _LANES)
    while tn > _LANES and not fits(tm, tn):
        tn -= _LANES
    while tm > 8 and not fits(tm, tn):
        tm = _round_up(tm // 2, 8)
    return tm, tn


def semidual_loss(inputx, inputy, psi, *, tm=None, tn=None,
                  mxu_dtype=jnp.bfloat16):
    """Semi-dual OT loss; inputx (Nx, D), inputy (Ny, D), psi (Ny,).

    mxu_dtype controls only the MXU feed (x, y^T); (||y||^2 - psi), ||x||^2,
    the running min and all glue math stay f32.  Use jnp.float32 for a
    bit-close match to the reference formulation.
    """
    Nx, D = inputx.shape
    Ny, Dy = inputy.shape
    assert D == Dy and psi.shape == (Ny,)

    num_tc, budget, vmem_limit, tm_target = _hw_params()
    if tm is not None:
        tm_target = tm
    tn_target = tn if tn is not None else 2048

    in_bytes = jnp.dtype(mxu_dtype).itemsize
    tm, tn = _choose_tiles(Nx, Ny, D, in_bytes, budget,
                           tm_target, tn_target, num_tc)
    Nx_pad = _round_up(Nx, tm)
    Ny_pad = _round_up(Ny, tn)

    # (||y||^2 - psi) precomputed in f32 (reference numerics).  Padded columns
    # get +inf so they can never win the row-wise min (padded y^T cols are 0).
    yt = inputy.astype(jnp.float32).T                             # (D, Ny)
    y2 = jnp.sum(yt * yt, axis=0, keepdims=True)                  # (1, Ny)
    b = y2 - psi.astype(jnp.float32)[None, :]                     # (1, Ny)
    b = jnp.pad(b, ((0, 0), (0, Ny_pad - Ny)), constant_values=jnp.inf)

    # Fold the -2 into the resident operand (exact: power-of-two scale), so
    # the kernel does c = dot + b with no extra per-element multiply.  The
    # scale fuses into this cast/pad pass (no extra HBM traffic).
    xs_pad = jnp.pad((-2.0 * inputx.astype(jnp.float32)).astype(mxu_dtype),
                     ((0, Nx_pad - Nx), (0, 0)))
    yt_pad = jnp.pad(yt.astype(mxu_dtype), ((0, 0), (0, Ny_pad - Ny)))

    grid = (Nx_pad // tm, Ny_pad // tn)

    slab = pl.pallas_call(
        _semidual_min_kernel,
        out_shape=jax.ShapeDtypeStruct((Nx_pad, _LANES), jnp.float32),
        grid_spec=pltpu.PrefetchScalarGridSpec(
            num_scalar_prefetch=0,
            grid=grid,
            in_specs=[
                pl.BlockSpec((tm, D), lambda i, j: (i, 0)),   # resident -2x tile
                pl.BlockSpec((D, tn), lambda i, j: (0, j)),   # streamed y^T
                pl.BlockSpec((1, tn), lambda i, j: (0, j)),   # streamed y2 - psi
            ],
            out_specs=pl.BlockSpec((tm, _LANES), lambda i, j: (i, 0)),
        ),
        compiler_params=pltpu.CompilerParams(
            dimension_semantics=("parallel", "arbitrary"),
            vmem_limit_bytes=int(vmem_limit)),
    )(xs_pad, yt_pad, b)

    # Glue (XLA): cross-lane min, add f32 ||x||^2, drop padded rows, means.
    x2 = jnp.sum(inputx.astype(jnp.float32) ** 2, axis=1)         # (Nx,) f32
    per_row = jnp.min(slab[:Nx, :], axis=1) + x2
    return jnp.mean(per_row) + jnp.mean(psi.astype(jnp.float32))


def semidual_loss_ref(inputx, inputy, psi):
    """Pure-JAX reference matching the PyTorch forward exactly."""
    yt = inputy.T
    y2 = jnp.sum(yt ** 2, axis=0, keepdims=True)
    cxy = jnp.sum(inputx ** 2, axis=1, keepdims=True) + y2 - 2.0 * inputx @ yt
    return jnp.mean(jnp.min(cxy - psi[None, :], axis=1)) + jnp.mean(psi)


# TODO(synk): the usekeops=True branch (pykeops argmin + gather formulation)
# is mathematically equivalent to the default branch and is not implemented
# separately.

if __name__ == "__main__":
    key = jax.random.PRNGKey(0)
    kx, ky = jax.random.split(key)

    Nx, Ny, D = 128, 256, 128
    inputx = jax.random.normal(kx, (Nx, D), dtype=jnp.float32)
    inputy = jax.random.normal(ky, (Ny, D), dtype=jnp.float32)
    # Module __init__: psi = nn.Parameter(torch.zeros(inputy.shape[0]))
    psi = jnp.zeros((Ny,), dtype=jnp.float32)

    ref = semidual_loss_ref(inputx, inputy, psi)

    # f32 MXU feed: matches the reference formulation to f32 rounding.
    loss_f32 = jax.jit(
        functools.partial(semidual_loss, mxu_dtype=jnp.float32)
    )(inputx, inputy, psi)
    jax.block_until_ready(loss_f32)
    assert jnp.allclose(loss_f32, ref, rtol=1e-4, atol=1e-4), (loss_f32, ref)

    # Default (bf16 MXU feed — recommended): x^2 and b stay f32, so only the
    # -2 x.y term carries bf16 rounding; validated with a loose tolerance.
    loss = jax.jit(semidual_loss)(inputx, inputy, psi)
    jax.block_until_ready(loss)
    assert abs(float(loss) - float(ref)) <= 0.05 * abs(float(ref)) + 1.0, (
        loss, ref)

    print("KERNEL_OK")
</pallas_src>

<mosaic_0001>
module attributes {stable_mosaic.version = 11 : i64} {
  func.func @_semidual_min_kernel(%arg0: i32, %arg1: i32, %arg2: memref<128x128xf32, #tpu.memory_space<vmem>>, %arg3: memref<128x256xf32, #tpu.memory_space<vmem>>, %arg4: memref<1x256xf32, #tpu.memory_space<vmem>>, %arg5: memref<128x128xf32, #tpu.memory_space<vmem>>) attributes {dimension_semantics = [#tpu.dimension_semantics<parallel>, #tpu.dimension_semantics<arbitrary>], iteration_bounds = array<i64: 1, 1>, scalar_prefetch = 0 : i64, scratch_operands = 0 : i64, tpu.core_type = #tpu.core_type<tc>, window_params = [{transform_indices = @transform_0, window_bounds = array<i64: 128, 128>}, {transform_indices = @transform_1, window_bounds = array<i64: 128, 256>}, {transform_indices = @transform_2, window_bounds = array<i64: 1, 256>}, {transform_indices = @transform_3, window_bounds = array<i64: 128, 128>}]} {
    %c0_i32 = arith.constant 0 : i32
    %0 = arith.cmpi eq, %arg1, %c0_i32 : i32
    %1 = arith.extui %0 : i1 to i32
    %c0_i32_0 = arith.constant 0 : i32
    %2 = arith.cmpi ne, %1, %c0_i32_0 : i32
    scf.if %2 {
      %cst_10 = arith.constant 0x7F800000 : f32
      %15 = vector.broadcast %cst_10 : f32 to vector<128x128xf32>
      %c0_11 = arith.constant 0 : index
      %c0_12 = arith.constant 0 : index
      %16 = vector.load %arg5[%c0_11, %c0_12] : memref<128x128xf32, #tpu.memory_space<vmem>>, vector<128x128xf32>
      tpu.vector_store %arg5[%c0_11, %c0_12], %15 {strides = array<i32>} : memref<128x128xf32, #tpu.memory_space<vmem>>, vector<128x128xf32>,
    } else {
    }
    %c0 = arith.constant 0 : index
    %c0_1 = arith.constant 0 : index
    %3 = vector.load %arg2[%c0, %c0_1] : memref<128x128xf32, #tpu.memory_space<vmem>>, vector<128x128xf32>
    %c0_2 = arith.constant 0 : index
    %c0_3 = arith.constant 0 : index
    %4 = vector.load %arg3[%c0_2, %c0_3] : memref<128x256xf32, #tpu.memory_space<vmem>>, vector<128x256xf32>
    %cst = arith.constant dense<0.000000e+00> : vector<128x256xf32>
    %5 = tpu.matmul %3, %4, %cst {dimension_numbers = #tpu.dot_dimension_numbers<[1], [0], [0], [1], [0, 0, 1, 1], [], []>} : vector<128x128xf32>, vector<128x256xf32>, vector<128x256xf32> -> vector<128x256xf32>
    %c0_4 = arith.constant 0 : index
    %c0_5 = arith.constant 0 : index
    %6 = vector.load %arg4[%c0_4, %c0_5] : memref<1x256xf32, #tpu.memory_space<vmem>>, vector<1x256xf32>
    %7 = vector.broadcast %6 : vector<1x256xf32> to vector<128x256xf32>
    %8 = arith.addf %5, %7 : vector<128x256xf32>
    %9 = vector.extract_strided_slice %8 {offsets = [0, 0], sizes = [128, 128], strides = [1, 1]} : vector<128x256xf32> to vector<128x128xf32>
    %10 = vector.extract_strided_slice %8 {offsets = [0, 128], sizes = [128, 128], strides = [1, 1]} : vector<128x256xf32> to vector<128x128xf32>
    %11 = arith.minimumf %9, %10 : vector<128x128xf32>
    %c0_6 = arith.constant 0 : index
    %c0_7 = arith.constant 0 : index
    %12 = vector.load %arg5[%c0_6, %c0_7] : memref<128x128xf32, #tpu.memory_space<vmem>>, vector<128x128xf32>
    %13 = arith.minimumf %12, %11 : vector<128x128xf32>
    %c0_8 = arith.constant 0 : index
    %c0_9 = arith.constant 0 : index
    %14 = vector.load %arg5[%c0_8, %c0_9] : memref<128x128xf32, #tpu.memory_space<vmem>>, vector<128x128xf32>
    tpu.vector_store %arg5[%c0_8, %c0_9], %13 {strides = array<i32>} : memref<128x128xf32, #tpu.memory_space<vmem>>, vector<128x128xf32>,
    return
  }
  func.func @transform_0(%arg0: i32, %arg1: i32) -> (i32, i32) {
    %c0_i32 = arith.constant 0 : i32
    %c0_i32_0 = arith.constant 0 : i32
    return %arg0, %c0_i32 : i32, i32
  }
  func.func @transform_1(%arg0: i32, %arg1: i32) -> (i32, i32) {
    %c0_i32 = arith.constant 0 : i32
    %c0_i32_0 = arith.constant 0 : i32
    return %c0_i32, %arg1 : i32, i32
  }
  func.func @transform_2(%arg0: i32, %arg1: i32) -> (i32, i32) {
    %c0_i32 = arith.constant 0 : i32
    %c0_i32_0 = arith.constant 0 : i32
    return %c0_i32, %arg1 : i32, i32
  }
  func.func @transform_3(%arg0: i32, %arg1: i32) -> (i32, i32) {
    %c0_i32 = arith.constant 0 : i32
    %c0_i32_0 = arith.constant 0 : i32
    return %arg0, %c0_i32 : i32, i32
  }
}

</mosaic_0001>

<bundles_post_ra>
// kernel: semidual_loss.1
= control target key start
LH: loop header
LB: loop body
LE: loop exit
PB: predicated region body
PF: predicated region fallthrough
CT: control target
= control target key end

     0   :  { %8 = vsyncpa [#allocation3], 0  ;;  %s664_s0 = inlined_call_operand.hbm [shape: f32[128,128], index: 0, kind: input, shape index: {}]   ;;  %s665_s1 = inlined_call_operand.hbm [shape: f32[128,256], index: 1, kind: input, shape index: {}]   ;;  %s666_s2 = inlined_call_operand.hbm [shape: f32[1,256], index: 2, kind: input, shape index: {}]   ;;  %s667_s3 = inlined_call_operand.hbm [shape: f32[128,128], index: 3, kind: output, shape index: {}]  }
   0x1   :  { %9 = vsyncpa [#allocation6], 0 }
   0x2   :  { %10 = vsyncpa [#allocation4], 0  ;;  %s529_s12 = smov [#allocation5]   ;;  %s435_s16 = scalar_lea.hbm %s665_s1, 4096 }
   0x3   :  { %s28_s13 = sshll.u32 %s529_s12, 4  ;;  %p436_p0 = scmp.ne.s32.totalorder %s665_s1, %s435_s16  ;;  %s29_s13 = int_to_ptr.vmem [resolvable:$true] %s28_s13 }
   0x4   :  { %p439_p1 = scmp.lt.u32.totalorder %s435_s16, %s665_s1 }
   0x6   :  { %p441_p2 = pnand %p439_p1, %p436_p0 }
   0x8   :  { %444 = shalt.err (!%p441_p2)
}
   0x9   :  { %s445_s21 = scalar_lea.vmem %s29_s13, 4096  ;;  %p450_p4 = scmp.lt.s32.totalorder %s29_s13, %s29_s13 }
   0xa   :  { %p446_p3 = scmp.ne.s32.totalorder %s29_s13, %s445_s21  ;;  %p451_p5 = scmp.lt.s32.totalorder %s445_s21, %s445_s21 }
   0xc   :  { %p452_p6 = por %p451_p5, %p450_p4 }
   0xe   :  { %p453_p7 = pnand %p452_p6, %p446_p3 }
  0x10   :  { %456 = shalt.err (!%p453_p7)
}
  0x11   :  { %s530_s22 = smov 256   ;;  %s531_s23 = smov 16  }
  0x12   :  { %34 = dma.hbm_to_vmem [thread:$0]  %s665_s1, 4096, %s29_s13, [#allocation6], %s530_s22, %s530_s22, %s531_s23  }
  0x13   :  { %s532_s26 = smov [#allocation2]   ;;  %s457_s30 = scalar_lea.hbm %s664_s0, 2048 }
  0x14   :  { %s16_s27 = sshll.u32 %s532_s26, 4  ;;  %p458_p8 = scmp.ne.s32.totalorder %s664_s0, %s457_s30  ;;  %s17_s27 = int_to_ptr.vmem [resolvable:$true] %s16_s27 }
  0x15   :  { %p461_p9 = scmp.lt.u32.totalorder %s457_s30, %s664_s0 }
  0x17   :  { %p463_p10 = pnand %p461_p9, %p458_p8 }
  0x19   :  { %466 = shalt.err (!%p463_p10)
}
  0x1a   :  { %s467_s8 = scalar_lea.vmem %s17_s27, 2048  ;;  %p472_p12 = scmp.lt.s32.totalorder %s17_s27, %s17_s27 }
  0x1b   :  { %p468_p11 = scmp.ne.s32.totalorder %s17_s27, %s467_s8  ;;  %p473_p13 = scmp.lt.s32.totalorder %s467_s8, %s467_s8 }
  0x1d   :  { %p474_p0 = por %p473_p13, %p472_p12 }
  0x1f   :  { %p475_p1 = pnand %p474_p0, %p468_p11 }
  0x21   :  { %478 = shalt.err (!%p475_p1)
}
  0x22   :  { %s533_s1 = smov 128   ;;  %s534_s9 = smov 8  }
  0x23   :  { %22 = dma.hbm_to_vmem [thread:$0]  %s664_s0, 2048, %s17_s27, [#allocation3], %s533_s1, %s533_s1, %s534_s9  }
  0x24   :  { %s535_s12 = smov [#allocation7]   ;;  %s479_s16 = scalar_lea.hbm %s666_s2, 32 }
  0x25   :  { %s41_s13 = sshll.u32 %s535_s12, 4  ;;  %p480_p2 = scmp.ne.s32.totalorder %s666_s2, %s479_s16  ;;  %s42_s13 = int_to_ptr.vmem [resolvable:$true] %s41_s13 }
  0x26   :  { %p483_p3 = scmp.lt.u32.totalorder %s479_s16, %s666_s2 }
  0x28   :  { %p485_p4 = pnand %p483_p3, %p480_p2 }
  0x2a   :  { %488 = shalt.err (!%p485_p4)
}
  0x2b   :  { %s489_s21 = scalar_lea.vmem %s42_s13, 32  ;;  %p494_p6 = scmp.lt.s32.totalorder %s42_s13, %s42_s13 }
  0x2c   :  { %p490_p5 = scmp.ne.s32.totalorder %s42_s13, %s489_s21  ;;  %p495_p7 = scmp.lt.s32.totalorder %s489_s21, %s489_s21 }
  0x2e   :  { %p496_p8 = por %p495_p7, %p494_p6 }
  0x30   :  { %p497_p9 = pnand %p496_p8, %p490_p5 }
  0x32   :  { %500 = shalt.err (!%p497_p9)
}
  0x33   :  { %44 = dma.hbm_to_vmem [thread:$0]  %s666_s2, 32, %s42_s13, [#allocation6]  }
  0x34   :  { %523 = dma.done.wait [#allocation3], 2048  }
  0x35   :  { %524 = vsyncadd [#allocation3], 4294965248 }
  0x36   :  { %525 = dma.done.wait [#allocation6], 4128  }
  0x37   :  { %526 = vsyncadd [#allocation6], 4294963168  ;;  %v536_v0 = vmov 0.0   ;;  %v91_v1 = vld [vmem:[#allocation5 + $0x8] sm:$0xff]  ;;  %v93_v2 = vld [vmem:[#allocation5 + $0x18] sm:$0xff]  ;;  %s537_s2 = smov [#allocation8]  }
  0x38   :  { %198 = vmatprep.mubr.f32.mxu0 %v536_v0  ;;  %246 = vmatprep.mubr.f32.mxu1 %v536_v0  ;;  %v90_v3 = vld [vmem:[#allocation5] sm:$0xff]  ;;  %v377_v4 = vpack.c.bf16 %v93_v2, %v91_v1  ;;  %v92_v5 = vld [vmem:[#allocation5 + $0x10] sm:$0xff]  ;;  %v95_v6 = vld [vmem:[#allocation5 + $0x28] sm:$0xff]  ;;  %v124_v2 = vlaneseq  ;;  %s364_s23 = sshll.u32 %s537_s2, 4  ;;  %s365_s23 = int_to_ptr.vmem [resolvable:$true] %s364_s23 }
  0x39   :  { %v97_v7 = vld [vmem:[#allocation5 + $0x38] sm:$0xff]  ;;  %v379_v8 = vpack.c.bf16 %v92_v5, %v90_v3  ;;  %v94_v10 = vld [vmem:[#allocation5 + $0x20] sm:$0xff]  ;;  %v96_v11 = vld [vmem:[#allocation5 + $0x30] sm:$0xff]  ;;  %s501_s24 = scalar_lea.vmem %s365_s23, 2048  ;;  %p506_p11 = scmp.lt.s32.totalorder %s365_s23, %s365_s23 }
  0x3a   :  { %v381_v9 = vpack.c.bf16 %v97_v7, %v95_v6  ;;  %v99_v12 = vld [vmem:[#allocation5 + $0x48] sm:$0xff]  ;;  %378 = vmatprep.subr.bf16.mxu0 %v377_v4  ;;  %409 = vmatprep.subr.bf16.mxu1 %v377_v4  ;;  %v101_v13 = vld [vmem:[#allocation5 + $0x58] sm:$0xff]  ;;  %v383_v14 = vpack.c.bf16 %v96_v11, %v94_v10  ;;  %v98_v16 = vld [vmem:[#allocation5 + $0x40] sm:$0xff]  ;;  %v125_v3 = vshrl.u32 %v124_v2, 7  ;;  %p502_p10 = scmp.ne.s32.totalorder %s365_s23, %s501_s24  ;;  %p507_p12 = scmp.lt.s32.totalorder %s501_s24, %s501_s24 }
  0x3b   :  { %380 = vmatpush1.bf16.msra.mxu0 %v379_v8  ;;  %417 = vmatpush1.bf16.msra.mxu1 %v379_v8  ;;  %v385_v15 = vpack.c.bf16 %v101_v13, %v99_v12  ;;  %v100_v17 = vld [vmem:[#allocation5 + $0x50] sm:$0xff]  ;;  %v103_v18 = vld [vmem:[#allocation5 + $0x68] sm:$0xff]  ;;  %v105_v19 = vld [vmem:[#allocation5 + $0x78] sm:$0xff] }
  0x3c   :  { %382 = vmatprep.subr.bf16.mxu0 %v381_v9  ;;  %410 = vmatprep.subr.bf16.mxu1 %v381_v9  ;;  %v387_v20 = vpack.c.bf16 %v100_v17, %v98_v16  ;;  %v389_v21 = vpack.c.bf16 %v105_v19, %v103_v18  ;;  %v102_v22 = vld [vmem:[#allocation5 + $0x60] sm:$0xff]  ;;  %v104_v23 = vld [vmem:[#allocation5 + $0x70] sm:$0xff]  ;;  %v107_v24 = vld [vmem:[#allocation5 + $0x88] sm:$0xff]  ;;  %v126_v4 = vsub.s32 0, %v125_v3  ;;  %v130_v6 = vsub.s32 1, %v125_v3  ;;  %p508_p13 = por %p507_p12, %p506_p11 }
  0x3d   :  { %v109_v25 = vld [vmem:[#allocation5 + $0x98] sm:$0xff]  ;;  %v391_v26 = vpack.c.bf16 %v104_v23, %v102_v22  ;;  %v106_v28 = vld [vmem:[#allocation5 + $0x80] sm:$0xff]  ;;  %v108_v29 = vld [vmem:[#allocation5 + $0x90] sm:$0xff] }
  0x3e   :  { %v393_v27 = vpack.c.bf16 %v109_v25, %v107_v24  ;;  %v111_v30 = vld [vmem:[#allocation5 + $0xa8] sm:$0xff]  ;;  %v113_v31 = vld [vmem:[#allocation5 + $0xb8] sm:$0xff]  ;;  %v395_v32 = vpack.c.bf16 %v108_v29, %v106_v28  ;;  %v110_v34 = vld [vmem:[#allocation5 + $0xa0] sm:$0xff]  ;;  %p509_p0 = pnand %p508_p13, %p502_p10 }
  0x3f   :  { %384 = vmatpush1.bf16.msra.mxu0 %v383_v14  ;;  %418 = vmatpush1.bf16.msra.mxu1 %v383_v14  ;;  %v397_v33 = vpack.c.bf16 %v113_v31, %v111_v30  ;;  %v112_v35 = vld [vmem:[#allocation5 + $0xb0] sm:$0xff]  ;;  %v115_v36 = vld [vmem:[#allocation5 + $0xc8] sm:$0xff]  ;;  %v117_v37 = vld [vmem:[#allocation5 + $0xd8] sm:$0xff] }
  0x40   :  { %386 = vmatprep.subr.bf16.mxu0 %v385_v15  ;;  %411 = vmatprep.subr.bf16.mxu1 %v385_v15  ;;  %v399_v38 = vpack.c.bf16 %v112_v35, %v110_v34  ;;  %v401_v39 = vpack.c.bf16 %v117_v37, %v115_v36  ;;  %v114_v40 = vld [vmem:[#allocation5 + $0xc0] sm:$0xff]  ;;  %v116_v41 = vld [vmem:[#allocation5 + $0xd0] sm:$0xff]  ;;  %v119_v42 = vld [vmem:[#allocation5 + $0xe8] sm:$0xff] }
  0x41   :  { %v121_v43 = vld [vmem:[#allocation5 + $0xf8] sm:$0xff]  ;;  %v403_v44 = vpack.c.bf16 %v116_v41, %v114_v40  ;;  %v118_v46 = vld [vmem:[#allocation5 + $0xe0] sm:$0xff]  ;;  %v120_v47 = vld [vmem:[#allocation5 + $0xf0] sm:$0xff] }
  0x42   :  { %v405_v45 = vpack.c.bf16 %v121_v43, %v119_v42  ;;  %v407_v48 = vpack.c.bf16 %v120_v47, %v118_v46  ;;  %v74_v49 = vld [vmem:[#allocation2] sm:$0xff]  ;;  %v75_v51 = vld [vmem:[#allocation2 + $0x8] sm:$0xff]  ;;  %v76_v53 = vld [vmem:[#allocation2 + $0x10] sm:$0xff] }
  0x43   :  { %388 = vmatpush1.bf16.msra.mxu0 %v387_v20  ;;  %419 = vmatpush1.bf16.msra.mxu1 %v387_v20  ;;  %v82_v50 = vld [vmem:[#allocation2 + $0x40] sm:$0xff]  ;;  %v83_v52 = vld [vmem:[#allocation2 + $0x48] sm:$0xff]  ;;  %v84_v54 = vld [vmem:[#allocation2 + $0x50] sm:$0xff] }
  0x44   :  { %390 = vmatprep.subr.bf16.mxu0 %v389_v21  ;;  %412 = vmatprep.subr.bf16.mxu1 %v389_v21  ;;  %v77_v55 = vld [vmem:[#allocation2 + $0x18] sm:$0xff]  ;;  %v78_v57 = vld [vmem:[#allocation2 + $0x20] sm:$0xff]  ;;  %v79_v59 = vld [vmem:[#allocation2 + $0x28] sm:$0xff] }
  0x45   :  { %v85_v56 = vld [vmem:[#allocation2 + $0x58] sm:$0xff]  ;;  %v86_v58 = vld [vmem:[#allocation2 + $0x60] sm:$0xff]  ;;  %v87_v60 = vld [vmem:[#allocation2 + $0x68] sm:$0xff] }
  0x46   :  { %v80_v61 = vld [vmem:[#allocation2 + $0x30] sm:$0xff]  ;;  %v81_v63 = vld [vmem:[#allocation2 + $0x38] sm:$0xff]  ;;  %v122_v5 = vld [vmem:[#allocation7] sm:$0x3] }
  0x47   :  { %392 = vmatpush1.bf16.msra.mxu0 %v391_v26  ;;  %420 = vmatpush1.bf16.msra.mxu1 %v391_v26  ;;  %v88_v62 = vld [vmem:[#allocation2 + $0x70] sm:$0xff]  ;;  %v89_v1 = vld [vmem:[#allocation2 + $0x78] sm:$0xff]  ;;  %v613_v7 = vrot.slane %v122_v5, %v126_v4  ;;  %v615_v8 = vrot.slane %v122_v5, %v130_v6 }
  0x48   :  { %394 = vmatprep.subr.bf16.mxu0 %v393_v27  ;;  %413 = vmatprep.subr.bf16.mxu1 %v393_v27 }
  0x4b   :  { %396 = vmatpush1.bf16.msra.mxu0 %v395_v32  ;;  %421 = vmatpush1.bf16.msra.mxu1 %v395_v32 }
  0x4c   :  { %398 = vmatprep.subr.bf16.mxu0 %v397_v33  ;;  %414 = vmatprep.subr.bf16.mxu1 %v397_v33 }
  0x4f   :  { %400 = vmatpush1.bf16.msra.mxu0 %v399_v38  ;;  %422 = vmatpush1.bf16.msra.mxu1 %v399_v38 }
  0x50   :  { %402 = vmatprep.subr.bf16.mxu0 %v401_v39  ;;  %415 = vmatprep.subr.bf16.mxu1 %v401_v39 }
  0x53   :  { %404 = vmatpush1.bf16.msra.mxu0 %v403_v44  ;;  %423 = vmatpush1.bf16.msra.mxu1 %v403_v44 }
  0x54   :  { %406 = vmatprep.subr.bf16.mxu0 %v405_v45  ;;  %416 = vmatprep.subr.bf16.mxu1 %v405_v45 }
  0x57   :  { %408 = vmatpush1.bf16.msra.mxu0 %v407_v48  ;;  %424 = vmatpush1.bf16.msra.mxu1 %v407_v48 }
  0x5a   :  { %199 = vmatmul.mubr.f32.vlgmr.msra.gmra.mrb[0].mxu0 %v74_v49  ;;  %247 = vmatmul.mubr.f32.vlgmr.msra.gmra.mrb[0].mxu1 %v82_v50 }
  0x5b   :  { %204 = vmatprep.mubr.f32.mxu0 %v536_v0  ;;  %252 = vmatprep.mubr.f32.mxu1 %v536_v0 }
  0x5e   :  { %205 = vmatmul.mubr.f32.gmra.mrb[2].mxu0 %v75_v51  ;;  %253 = vmatmul.mubr.f32.gmra.mrb[2].mxu1 %v83_v52 }
  0x5f   :  { %210 = vmatprep.mubr.f32.mxu0 %v536_v0  ;;  %258 = vmatprep.mubr.f32.mxu1 %v536_v0 }
  0x62   :  { %211 = vmatmul.mubr.f32.gmra.mrb[4].mxu0 %v76_v53  ;;  %259 = vmatmul.mubr.f32.gmra.mrb[4].mxu1 %v84_v54 }
  0x63   :  { %216 = vmatprep.mubr.f32.mxu0 %v536_v0  ;;  %264 = vmatprep.mubr.f32.mxu1 %v536_v0 }
  0x66   :  { %217 = vmatmul.mubr.f32.gmra.mrb[6].mxu0 %v77_v55  ;;  %265 = vmatmul.mubr.f32.gmra.mrb[6].mxu1 %v85_v56 }
  0x67   :  { %222 = vmatprep.mubr.f32.mxu0 %v536_v0  ;;  %270 = vmatprep.mubr.f32.mxu1 %v536_v0 }
  0x6a   :  { %223 = vmatmul.mubr.f32.gmra.mrb[8].mxu0 %v78_v57  ;;  %271 = vmatmul.mubr.f32.gmra.mrb[8].mxu1 %v86_v58 }
  0x6b   :  { %228 = vmatprep.mubr.f32.mxu0 %v536_v0  ;;  %276 = vmatprep.mubr.f32.mxu1 %v536_v0 }
  0x6e   :  { %229 = vmatmul.mubr.f32.gmra.mrb[10].mxu0 %v79_v59  ;;  %277 = vmatmul.mubr.f32.gmra.mrb[10].mxu1 %v87_v60 }
  0x6f   :  { %234 = vmatprep.mubr.f32.mxu0 %v536_v0  ;;  %282 = vmatprep.mubr.f32.mxu1 %v536_v0 }
  0x72   :  { %235 = vmatmul.mubr.f32.gmra.mrb[12].mxu0 %v80_v61  ;;  %283 = vmatmul.mubr.f32.gmra.mrb[12].mxu1 %v88_v62 }
  0x73   :  { %240 = vmatprep.mubr.f32.mxu0 %v536_v0  ;;  %288 = vmatprep.mubr.f32.mxu1 %v536_v0 }
  0x76   :  { %241 = vmatmul.mubr.f32.gmra.mrb[14].mxu0 %v81_v63  ;;  %289 = vmatmul.mubr.f32.gmra.mrb[14].mxu1 %v89_v1 }
 0x12d   :  { %v200_v9 = vpop.f32.mrb[0].mxu0  ;;  %v248_v10 = vpop.f32.mrb[0].mxu1 }
 0x12e   :  { %v201_v11 = vadd.f32 %v200_v9, %v613_v7  ;;  %v249_v12 = vadd.f32 %v248_v10, %v613_v7  ;;  %v202_v0 = vpop.f32.mrb[1].mxu0  ;;  %v250_v13 = vpop.f32.mrb[1].mxu1 }
 0x12f   :  { %v203_v14 = vadd.f32 %v202_v0, %v615_v8  ;;  %v251_v15 = vadd.f32 %v250_v13, %v615_v8 }
 0x131   :  { %v295_v16 = vmin.f32 %v201_v11, %v203_v14  ;;  %v303_v17 = vmin.f32 %v249_v12, %v251_v15  ;;  %v206_v18 = vpop.f32.mrb[2].mxu0  ;;  %v254_v19 = vpop.f32.mrb[2].mxu1 }
 0x132   :  { %v207_v20 = vadd.f32 %v206_v18, %v613_v7  ;;  %v255_v21 = vadd.f32 %v254_v19, %v613_v7  ;;  %v208_v22 = vpop.f32.mrb[3].mxu0  ;;  %v256_v23 = vpop.f32.mrb[3].mxu1 }
 0x133   :  { %v209_v24 = vadd.f32 %v208_v22, %v615_v8  ;;  %v257_v25 = vadd.f32 %v256_v23, %v615_v8  ;;  %343 = vst [vmem:[#allocation8] sm:$0xff] %v295_v16  ;;  %351 = vst [vmem:[#allocation8 + $0x40] sm:$0xff] %v303_v17 }
 0x135   :  { %v296_v26 = vmin.f32 %v207_v20, %v209_v24  ;;  %v304_v27 = vmin.f32 %v255_v21, %v257_v25  ;;  %v212_v28 = vpop.f32.mrb[4].mxu0  ;;  %v260_v29 = vpop.f32.mrb[4].mxu1 }
 0x136   :  { %v213_v30 = vadd.f32 %v212_v28, %v613_v7  ;;  %v261_v31 = vadd.f32 %v260_v29, %v613_v7  ;;  %v214_v32 = vpop.f32.mrb[5].mxu0  ;;  %v262_v33 = vpop.f32.mrb[5].mxu1 }
 0x137   :  { %v215_v34 = vadd.f32 %v214_v32, %v615_v8  ;;  %v263_v35 = vadd.f32 %v262_v33, %v615_v8  ;;  %344 = vst [vmem:[#allocation8 + $0x8] sm:$0xff] %v296_v26  ;;  %352 = vst [vmem:[#allocation8 + $0x48] sm:$0xff] %v304_v27 }
 0x139   :  { %v297_v36 = vmin.f32 %v213_v30, %v215_v34  ;;  %v305_v37 = vmin.f32 %v261_v31, %v263_v35  ;;  %v218_v38 = vpop.f32.mrb[6].mxu0  ;;  %v266_v39 = vpop.f32.mrb[6].mxu1 }
 0x13a   :  { %v219_v40 = vadd.f32 %v218_v38, %v613_v7  ;;  %v267_v41 = vadd.f32 %v266_v39, %v613_v7  ;;  %v220_v42 = vpop.f32.mrb[7].mxu0  ;;  %v268_v43 = vpop.f32.mrb[7].mxu1 }
 0x13b   :  { %v221_v44 = vadd.f32 %v220_v42, %v615_v8  ;;  %v269_v45 = vadd.f32 %v268_v43, %v615_v8  ;;  %345 = vst [vmem:[#allocation8 + $0x10] sm:$0xff] %v297_v36  ;;  %353 = vst [vmem:[#allocation8 + $0x50] sm:$0xff] %v305_v37 }
 0x13d   :  { %v298_v46 = vmin.f32 %v219_v40, %v221_v44  ;;  %v306_v47 = vmin.f32 %v267_v41, %v269_v45  ;;  %v224_v48 = vpop.f32.mrb[8].mxu0  ;;  %v272_v49 = vpop.f32.mrb[8].mxu1 }
 0x13e   :  { %v225_v50 = vadd.f32 %v224_v48, %v613_v7  ;;  %v273_v51 = vadd.f32 %v272_v49, %v613_v7  ;;  %v226_v52 = vpop.f32.mrb[9].mxu0  ;;  %v274_v53 = vpop.f32.mrb[9].mxu1 }
 0x13f   :  { %v227_v54 = vadd.f32 %v226_v52, %v615_v8  ;;  %v275_v55 = vadd.f32 %v274_v53, %v615_v8  ;;  %346 = vst [vmem:[#allocation8 + $0x18] sm:$0xff] %v298_v46  ;;  %354 = vst [vmem:[#allocation8 + $0x58] sm:$0xff] %v306_v47 }
 0x141   :  { %v299_v56 = vmin.f32 %v225_v50, %v227_v54  ;;  %v307_v57 = vmin.f32 %v273_v51, %v275_v55  ;;  %v230_v58 = vpop.f32.mrb[10].mxu0  ;;  %v278_v59 = vpop.f32.mrb[10].mxu1 }
 0x142   :  { %v231_v60 = vadd.f32 %v230_v58, %v613_v7  ;;  %v279_v61 = vadd.f32 %v278_v59, %v613_v7  ;;  %v232_v62 = vpop.f32.mrb[11].mxu0  ;;  %v280_v63 = vpop.f32.mrb[11].mxu1 }
 0x143   :  { %v233_v1 = vadd.f32 %v232_v62, %v615_v8  ;;  %v281_v2 = vadd.f32 %v280_v63, %v615_v8  ;;  %347 = vst [vmem:[#allocation8 + $0x20] sm:$0xff] %v299_v56  ;;  %355 = vst [vmem:[#allocation8 + $0x60] sm:$0xff] %v307_v57 }
 0x145   :  { %v300_v3 = vmin.f32 %v231_v60, %v233_v1  ;;  %v308_v4 = vmin.f32 %v279_v61, %v281_v2  ;;  %v236_v5 = vpop.f32.mrb[12].mxu0  ;;  %v284_v6 = vpop.f32.mrb[12].mxu1 }
 0x146   :  { %v237_v9 = vadd.f32 %v236_v5, %v613_v7  ;;  %v285_v10 = vadd.f32 %v284_v6, %v613_v7  ;;  %v238_v11 = vpop.f32.mrb[13].mxu0  ;;  %v286_v12 = vpop.f32.mrb[13].mxu1 }
 0x147   :  { %v239_v0 = vadd.f32 %v238_v11, %v615_v8  ;;  %v287_v13 = vadd.f32 %v286_v12, %v615_v8  ;;  %348 = vst [vmem:[#allocation8 + $0x28] sm:$0xff] %v300_v3  ;;  %356 = vst [vmem:[#allocation8 + $0x68] sm:$0xff] %v308_v4 }
 0x149   :  { %v301_v14 = vmin.f32 %v237_v9, %v239_v0  ;;  %v309_v15 = vmin.f32 %v285_v10, %v287_v13  ;;  %v242_v16 = vpop.f32.mrb[14].mxu0  ;;  %v290_v17 = vpop.f32.mrb[14].mxu1 }
 0x14a   :  { %v243_v18 = vadd.f32 %v242_v16, %v613_v7  ;;  %v291_v19 = vadd.f32 %v290_v17, %v613_v7  ;;  %v244_v20 = vpop.f32.mrb[15].mxu0  ;;  %v292_v21 = vpop.f32.mrb[15].mxu1 }
 0x14b   :  { %v245_v22 = vadd.f32 %v244_v20, %v615_v8  ;;  %v293_v23 = vadd.f32 %v292_v21, %v615_v8  ;;  %349 = vst [vmem:[#allocation8 + $0x30] sm:$0xff] %v301_v14  ;;  %357 = vst [vmem:[#allocation8 + $0x70] sm:$0xff] %v309_v15 }
 0x14d   :  { %v302_v24 = vmin.f32 %v243_v18, %v245_v22  ;;  %v310_v25 = vmin.f32 %v291_v19, %v293_v23 }
 0x14f   :  { %350 = vst [vmem:[#allocation8 + $0x38] sm:$0xff] %v302_v24  ;;  %358 = vst [vmem:[#allocation8 + $0x78] sm:$0xff] %v310_v25 }
 0x150   :  { %512 = shalt.err (!%p509_p0)
}
 0x151   :  { %s513_s27 = scalar_lea.hbm %s667_s3, 2048 }
 0x152   :  { %p514_p1 = scmp.ne.s32.totalorder %s667_s3, %s513_s27  ;;  %p517_p2 = scmp.lt.u32.totalorder %s513_s27, %s667_s3 }
 0x154   :  { %p519_p3 = pnand %p517_p2, %p514_p1 }
 0x156   :  { %522 = shalt.err (!%p519_p3)
}
 0x157   :  { %370 = dma.vmem_to_hbm [thread:$0]  %s365_s23, 2048, %s667_s3, [#allocation4], %s533_s1, %s533_s1, %s534_s9  }
 0x158   :  { %527 = dma.done.wait [#allocation4], 2048  }
 0x159   :  { %528 = vsyncadd [#allocation4], 4294965248 }
 0x15a   :  { %374 = vsyncpa [#allocation3], 1 }
 0x15b   :  { %375 = vsyncpa [#allocation6], 1 }
 0x15c   :  { %376 = vsyncpa [#allocation4], 1 }

</bundles_post_ra>
